<compile_context>
chip_gen: v6e
topology: v6e:2x2x1
jax: 0.10.0
libtpu: 0.0.40
codegen_flags: <defaults>
</compile_context>

<pallas_src>
import functools

import jax
import jax.numpy as jnp
from jax.experimental import pallas as pl
from jax.experimental.pallas import tpu as pltpu


def _round_up(n, m):
    return ((n + m - 1) // m) * m


def _policy_kernel(x_ref, w1_ref, b1_ref, wh_ref, bh_ref, out_ref, *,
                   max_action, action_dim):
    # fc1 + ReLU  (MXU matmul, f32 accumulation)
    x = x_ref[...]
    h = jnp.dot(x, w1_ref[...], preferred_element_type=jnp.float32) + b1_ref[...]
    h = jnp.maximum(h, 0.0)

    # Fused heads: one matmul producing [TB, 2A] = [mu_lin | std_lin].
    heads = jnp.dot(h, wh_ref[...], preferred_element_type=jnp.float32) + bh_ref[...]

    # mu path:  max_action * tanh(.)      (first A lanes)
    mu_all = max_action * jnp.tanh(heads)
    # std path: numerically stable softplus(.)   (last A lanes)
    sp_all = jnp.maximum(heads, 0.0) + jnp.log1p(jnp.exp(-jnp.abs(heads)))

    # Per-lane select: lanes [0, A) -> mu, lanes [A, 2A) -> std.
    lane = jax.lax.broadcasted_iota(jnp.int32, heads.shape, dimension=1)
    out_ref[...] = jnp.where(lane < action_dim, mu_all, sp_all).astype(out_ref.dtype)


def policy_net_continuous(x, params, max_action, *, batch_tile=1024):
    """Forward pass of PolicyNetContinuous.

    x: [B, state_dim] float32
    params: dict with
        w1      [S, H],  b1      [1, H]
        w_heads [H, 2A], b_heads [1, 2A]   (cols 0..A-1 = mu head, A..2A-1 = std head)
    returns (mu [B, A], std [B, A])
    """
    B, S = x.shape
    H = params["w1"].shape[1]
    A2 = params["w_heads"].shape[1]
    A = A2 // 2

    # Batch tile: multiple of 8 (sublane), single grid step for B <= batch_tile.
    tb = min(batch_tile, _round_up(max(B, 1), 8))
    B_pad = _round_up(B, tb)
    if B_pad != B:
        x = jnp.pad(x, ((0, B_pad - B), (0, 0)))

    kernel = functools.partial(_policy_kernel,
                               max_action=float(max_action), action_dim=A)

    out = pl.pallas_call(
        kernel,
        out_shape=jax.ShapeDtypeStruct((B_pad, A2), jnp.float32),
        grid_spec=pltpu.PrefetchScalarGridSpec(
            num_scalar_prefetch=0,
            grid=(B_pad // tb,),
            in_specs=[
                pl.BlockSpec((tb, S), lambda i: (i, 0)),   # x: tiled over batch
                pl.BlockSpec((S, H), lambda i: (0, 0)),    # weights: VMEM-resident
                pl.BlockSpec((1, H), lambda i: (0, 0)),
                pl.BlockSpec((H, A2), lambda i: (0, 0)),
                pl.BlockSpec((1, A2), lambda i: (0, 0)),
            ],
            out_specs=pl.BlockSpec((tb, A2), lambda i: (i, 0)),
        ),
        compiler_params=pltpu.CompilerParams(
            dimension_semantics=("parallel",)),  # shards batch across TCs on v7x
    )(x, params["w1"], params["b1"], params["w_heads"], params["b_heads"])

    out = out[:B]
    return out[:, :A], out[:, A:]


def init_params(key, state_dim, hidden_dim, action_dim):
    """Deterministic init mimicking torch.nn.Linear default U(-1/sqrt(fan_in), .),
    with the two heads packed into a single fused [H, 2A] weight / [1, 2A] bias."""
    ks = jax.random.split(key, 6)

    def lin(kw, kb, fan_in, fan_out):
        bound = 1.0 / jnp.sqrt(jnp.float32(fan_in))
        # stored as [in, out] (transposed vs. PyTorch's [out, in])
        w = jax.random.uniform(kw, (fan_in, fan_out), jnp.float32, -bound, bound)
        b = jax.random.uniform(kb, (1, fan_out), jnp.float32, -bound, bound)
        return w, b

    w1, b1 = lin(ks[0], ks[1], state_dim, hidden_dim)
    w_mu, b_mu = lin(ks[2], ks[3], hidden_dim, action_dim)
    w_std, b_std = lin(ks[4], ks[5], hidden_dim, action_dim)
    return dict(
        w1=w1, b1=b1,
        w_heads=jnp.concatenate([w_mu, w_std], axis=1),    # [H, 2A]
        b_heads=jnp.concatenate([b_mu, b_std], axis=1),    # [1, 2A]
    )


if __name__ == "__main__":
    state_dim, hidden_dim, action_dim = 16, 32, 4
    max_action = 2.0
    batch = 2

    key = jax.random.PRNGKey(0)
    k_x, k_p = jax.random.split(key)
    x = jax.random.normal(k_x, (batch, state_dim), jnp.float32)
    params = init_params(k_p, state_dim, hidden_dim, action_dim)

    mu, std = policy_net_continuous(x, params, max_action)
    jax.block_until_ready((mu, std))

    # Pure-JAX reference check for sanity.
    h = jnp.maximum(x @ params["w1"] + params["b1"], 0.0)
    heads = h @ params["w_heads"] + params["b_heads"]
    mu_ref = max_action * jnp.tanh(heads[:, :action_dim])
    std_ref = jax.nn.softplus(heads[:, action_dim:])
    assert mu.shape == (batch, action_dim) and std.shape == (batch, action_dim)
    assert jnp.allclose(mu, mu_ref, atol=1e-5), "mu mismatch"
    assert jnp.allclose(std, std_ref, atol=1e-5), "std mismatch"

    print("KERNEL_OK")
</pallas_src>

<mosaic_0001>
module attributes {stable_mosaic.version = 11 : i64} {
  func.func @_policy_kernel(%arg0: i32, %arg1: memref<8x16xf32, #tpu.memory_space<vmem>>, %arg2: memref<16x32xf32, #tpu.memory_space<vmem>>, %arg3: memref<1x32xf32, #tpu.memory_space<vmem>>, %arg4: memref<32x8xf32, #tpu.memory_space<vmem>>, %arg5: memref<1x8xf32, #tpu.memory_space<vmem>>, %arg6: memref<8x8xf32, #tpu.memory_space<vmem>>) attributes {dimension_semantics = [#tpu.dimension_semantics<parallel>], iteration_bounds = array<i64: 1>, scalar_prefetch = 0 : i64, scratch_operands = 0 : i64, tpu.core_type = #tpu.core_type<tc>, window_params = [{transform_indices = @transform_0, window_bounds = array<i64: 8, 16>}, {pipeline_mode = #tpu.pipeline_mode<synchronous>, transform_indices = @transform_1, window_bounds = array<i64: 16, 32>}, {pipeline_mode = #tpu.pipeline_mode<synchronous>, transform_indices = @transform_2, window_bounds = array<i64: 1, 32>}, {pipeline_mode = #tpu.pipeline_mode<synchronous>, transform_indices = @transform_3, window_bounds = array<i64: 32, 8>}, {pipeline_mode = #tpu.pipeline_mode<synchronous>, transform_indices = @transform_4, window_bounds = array<i64: 1, 8>}, {transform_indices = @transform_5, window_bounds = array<i64: 8, 8>}]} {
    %c0 = arith.constant 0 : index
    %c0_0 = arith.constant 0 : index
    %0 = vector.load %arg1[%c0, %c0_0] : memref<8x16xf32, #tpu.memory_space<vmem>>, vector<8x16xf32>
    %c0_1 = arith.constant 0 : index
    %c0_2 = arith.constant 0 : index
    %1 = vector.load %arg2[%c0_1, %c0_2] : memref<16x32xf32, #tpu.memory_space<vmem>>, vector<16x32xf32>
    %cst = arith.constant dense<0.000000e+00> : vector<8x32xf32>
    %2 = tpu.matmul %0, %1, %cst {dimension_numbers = #tpu.dot_dimension_numbers<[1], [0], [0], [1], [0, 0, 1, 1], [], []>} : vector<8x16xf32>, vector<16x32xf32>, vector<8x32xf32> -> vector<8x32xf32>
    %c0_3 = arith.constant 0 : index
    %c0_4 = arith.constant 0 : index
    %3 = vector.load %arg3[%c0_3, %c0_4] : memref<1x32xf32, #tpu.memory_space<vmem>>, vector<1x32xf32>
    %4 = vector.broadcast %3 : vector<1x32xf32> to vector<8x32xf32>
    %5 = arith.addf %2, %4 : vector<8x32xf32>
    %cst_5 = arith.constant 0.000000e+00 : f32
    %6 = vector.broadcast %cst_5 : f32 to vector<8x32xf32>
    %7 = arith.maximumf %5, %6 : vector<8x32xf32>
    %c0_6 = arith.constant 0 : index
    %c0_7 = arith.constant 0 : index
    %8 = vector.load %arg4[%c0_6, %c0_7] : memref<32x8xf32, #tpu.memory_space<vmem>>, vector<32x8xf32>
    %cst_8 = arith.constant dense<0.000000e+00> : vector<8x8xf32>
    %9 = tpu.matmul %7, %8, %cst_8 {dimension_numbers = #tpu.dot_dimension_numbers<[1], [0], [0], [1], [0, 0, 1, 1], [], []>} : vector<8x32xf32>, vector<32x8xf32>, vector<8x8xf32> -> vector<8x8xf32>
    %c0_9 = arith.constant 0 : index
    %c0_10 = arith.constant 0 : index
    %10 = vector.load %arg5[%c0_9, %c0_10] : memref<1x8xf32, #tpu.memory_space<vmem>>, vector<1x8xf32>
    %11 = vector.broadcast %10 : vector<1x8xf32> to vector<8x8xf32>
    %12 = arith.addf %9, %11 : vector<8x8xf32>
    %13 = math.tanh %12 : vector<8x8xf32>
    %cst_11 = arith.constant 2.000000e+00 : f32
    %14 = vector.broadcast %cst_11 : f32 to vector<8x8xf32>
    %15 = arith.mulf %14, %13 : vector<8x8xf32>
    %cst_12 = arith.constant 0.000000e+00 : f32
    %16 = vector.broadcast %cst_12 : f32 to vector<8x8xf32>
    %17 = arith.maximumf %12, %16 : vector<8x8xf32>
    %18 = math.absf %12 : vector<8x8xf32>
    %cst_13 = arith.constant 0.000000e+00 : f32
    %19 = vector.broadcast %cst_13 : f32 to vector<8x8xf32>
    %20 = arith.subf %19, %18 : vector<8x8xf32>
    %21 = math.exp %20 : vector<8x8xf32>
    %22 = math.log1p %21 : vector<8x8xf32>
    %23 = arith.addf %17, %22 : vector<8x8xf32>
    %24 = tpu.iota {dimensions = array<i32: 1>} : vector<8x8xi32>
    %c4_i32 = arith.constant 4 : i32
    %25 = vector.broadcast %c4_i32 : i32 to vector<8x8xi32>
    %26 = arith.cmpi slt, %24, %25 : vector<8x8xi32>
    %27 = arith.select %26, %15, %23 : vector<8x8xi1>, vector<8x8xf32>
    %c0_14 = arith.constant 0 : index
    %c0_15 = arith.constant 0 : index
    %28 = vector.load %arg6[%c0_14, %c0_15] : memref<8x8xf32, #tpu.memory_space<vmem>>, vector<8x8xf32>
    tpu.vector_store %arg6[%c0_14, %c0_15], %27 {strides = array<i32>} : memref<8x8xf32, #tpu.memory_space<vmem>>, vector<8x8xf32>,
    return
  }
  func.func @transform_0(%arg0: i32) -> (i32, i32) {
    %c0_i32 = arith.constant 0 : i32
    %c0_i32_0 = arith.constant 0 : i32
    return %arg0, %c0_i32 : i32, i32
  }
  func.func @transform_1(%arg0: i32) -> (i32, i32) {
    %c0_i32 = arith.constant 0 : i32
    %c0_i32_0 = arith.constant 0 : i32
    %c0_i32_1 = arith.constant 0 : i32
    return %c0_i32, %c0_i32_0 : i32, i32
  }
  func.func @transform_2(%arg0: i32) -> (i32, i32) {
    %c0_i32 = arith.constant 0 : i32
    %c0_i32_0 = arith.constant 0 : i32
    %c0_i32_1 = arith.constant 0 : i32
    return %c0_i32, %c0_i32_0 : i32, i32
  }
  func.func @transform_3(%arg0: i32) -> (i32, i32) {
    %c0_i32 = arith.constant 0 : i32
    %c0_i32_0 = arith.constant 0 : i32
    %c0_i32_1 = arith.constant 0 : i32
    return %c0_i32, %c0_i32_0 : i32, i32
  }
  func.func @transform_4(%arg0: i32) -> (i32, i32) {
    %c0_i32 = arith.constant 0 : i32
    %c0_i32_0 = arith.constant 0 : i32
    %c0_i32_1 = arith.constant 0 : i32
    return %c0_i32, %c0_i32_0 : i32, i32
  }
  func.func @transform_5(%arg0: i32) -> (i32, i32) {
    %c0_i32 = arith.constant 0 : i32
    %c0_i32_0 = arith.constant 0 : i32
    return %arg0, %c0_i32 : i32, i32
  }
}

</mosaic_0001>

<bundles_post_ra>
// kernel: tpu_custom_call.1
= control target key start
LH: loop header
LB: loop body
LE: loop exit
PB: predicated region body
PF: predicated region fallthrough
CT: control target
= control target key end

     0   :  { %v289_v1 = vmov 0.0   ;;  %vm290_vm0 = vmmov 0   ;;  %s352_s0 = inlined_call_operand.vmem [shape: f32[8,16], index: 0, kind: input, shape index: {}]   ;;  %s353_s1 = inlined_call_operand.vmem [shape: f32[16,32], index: 1, kind: input, shape index: {}]   ;;  %s354_s2 = inlined_call_operand.vmem [shape: f32[1,32], index: 2, kind: input, shape index: {}]   ;;  %s355_s3 = inlined_call_operand.vmem [shape: f32[32,8], index: 3, kind: input, shape index: {}]   ;;  %s356_s4 = inlined_call_operand.vmem [shape: f32[1,8], index: 4, kind: input, shape index: {}]   ;;  %s357_s5 = inlined_call_operand.hbm [shape: f32[8,8], index: 5, kind: output, shape index: {}]  }
   0x1   :  { %v23_v0 = vld [vmem:[%s353_s1 + $0x8] sm:$0xff]  ;;  %240 = vmatprep.subr.mxu0 %v289_v1  ;;  %v22_v2 = vld [vmem:[%s353_s1] sm:$0xff]  ;;  %244 = vmatprep.mubr.msk.f32.mxu0 %vm290_vm0, %v289_v1  ;;  %v109_v3 = vld [vmem:[%s355_s3 + $0x18] sm:$0xff] }
   0x2   :  { %10 = vsyncpa [#allocation3], 0  ;;  %241 = vmatpush3.msra.mxu0 %v23_v0  ;;  %v21_v4 = vld [vmem:[%s352_s0] sm:$0xff]  ;;  %vm31_vm1 = vcmask 130048   ;;  %247 = vmatprep.subr.mxu1 %v289_v1  ;;  %v108_v5 = vld [vmem:[%s355_s3 + $0x10] sm:$0xff]  ;;  %vm117_vm2 = vcmask 261120   ;;  %v208_v23 = vlaneseq }
   0x3   :  { %242 = vmatprep.subr.mxu0 %v289_v1  ;;  %248 = vmatpush3.msra.mxu1 %v109_v3  ;;  %v107_v6 = vld [vmem:[%s355_s3 + $0x8] sm:$0xff]  ;;  %v106_v7 = vld [vmem:[%s355_s3] sm:$0xff]  ;;  %vm212_vm5 = vcmask 64512  }
   0x4   :  { %243 = vmatpush3.msra.mxu0 %v22_v2  ;;  %249 = vmatprep.subr.mxu1 %v289_v1  ;;  %v228_v8 = vld [vmem:[%s354_s2] ss:$0 sm:$0xff]  ;;  %v209_v26 = vand.u32 127, %v208_v23  ;;  %s291_s2 = smov [#allocation2]  }
   0x5   :  { %245 = vmatmul.mubr.msk.f32.vlgmr.msra.gmra.mxu0 %vm31_vm1, %v21_v4  ;;  %255 = vmatprep.mubr.msk.f32.mxu1 %vm290_vm0, %v289_v1  ;;  %v230_v13 = vld [vmem:[%s356_s4] ss:$0 sm:$0xff]  ;;  %s220_s3 = sshll.u32 %s291_s2, 4  ;;  %s221_s3 = int_to_ptr.vmem [resolvable:$true] %s220_s3 }
   0x6   :  { %250 = vmatpush3.msra.mxu1 %v108_v5  ;;  %vm210_vm4 = vcmp.lt.s32.totalorder %v209_v26, 4  ;;  %s267_s4 = scalar_lea.vmem %s221_s3, 128  ;;  %p272_p1 = scmp.lt.s32.totalorder %s221_s3, %s221_s3 }
   0x7   :  { %251 = vmatprep.subr.mxu1 %v289_v1  ;;  %p268_p0 = scmp.ne.s32.totalorder %s221_s3, %s267_s4  ;;  %p273_p2 = scmp.lt.s32.totalorder %s267_s4, %s267_s4 }
   0x8   :  { %252 = vmatpush3.msra.mxu1 %v107_v6 }
   0x9   :  { %253 = vmatprep.subr.mxu1 %v289_v1  ;;  %p274_p3 = por %p273_p2, %p272_p1 }
   0xa   :  { %254 = vmatpush3.msra.mxu1 %v106_v7 }
   0xb   :  { %p275_p4 = pnand %p274_p3, %p268_p0 }
  0xc5   :  { %v101_v9 = vpop.f32.mrf.mxu0 }
  0xc6   :  { %v102_v10 = vadd.f32 %v228_v8, %v101_v9 }
  0xc7   :  { %v246_v11 = vpop.f32.mrf.mxu0 }
  0xc8   :  { %v105_v12 = vmax.f32 %v102_v10, 0.0 }
  0xca   :  { %256 = vmatmul.mubr.msk.f32.vlgmr.msra.gmra.mxu1 %vm117_vm2, %v105_v12 }
 0x18a   :  { %v187_v14 = vpop.f32.mrf.mxu1 }
 0x18b   :  { %v188_v15 = vadd.f32 %v230_v13, %v187_v14 }
 0x18c   :  { %v257_v16 = vpop.f32.mrf.mxu1 }
 0x18d   :  { %v194_v17 = vand.u32 2147483647, %v188_v15  ;;  %v193_v31 = vmax.f32 %v188_v15, 0.0 }
 0x18f   :  { %v195_v18 = vsub.f32 0.0, %v194_v17 }
 0x191   :  { %v196_v19 = vmul.f32 1.442695, %v195_v18 }
 0x193   :  { %261 = vpow2.f32 %v196_v19 }
 0x1a0   :  { %v262_v20 = vpop.eup %261 }
 0x1a1   :  { %v198_v21 = vadd.f32 1.0, %v262_v20  ;;  %v201_v22 = vmul.f32 -0.5, %v262_v20  ;;  %v204_v25 = vand.u32 2147483647, %v262_v20 }
 0x1a3   :  { %263 = vlog2.f32 %v198_v21  ;;  %v202_v24 = vadd.f32 1.0, %v201_v22  ;;  %vm205_vm3 = vcmp.lt.f32.partialorder %v204_v25, 0.0004427343 }
 0x1a4   :  { %265 = vtanh.f32 %v188_v15 }
 0x1a5   :  { %v203_v30 = vmul.f32 %v262_v20, %v202_v24 }
 0x1b0   :  { %v264_v27 = vpop.eup %263 }
 0x1b1   :  { %v266_v28 = vpop.eup %265  ;;  %v200_v29 = vmul.f32 0.6931472, %v264_v27 }
 0x1b2   :  { %v192_v34 = vmul.f32 2.0, %v266_v28 }
 0x1b3   :  { %v206_v32 = vsel %vm205_vm3, %v203_v30, %v200_v29 }
 0x1b4   :  { %v207_v33 = vadd.f32 %v206_v32, %v193_v31 }
 0x1b6   :  { %v211_v35 = vsel %vm210_vm4, %v192_v34, %v207_v33 }
 0x1b7   :  { %213 = vst.msk [vmem:[#allocation2] sm:$0xff] %vm212_vm5, %v211_v35 }
 0x1b8   :  { %278 = shalt.err (!%p275_p4)
}
 0x1b9   :  { %223 = dma.vmem_to_hbm [thread:$0]  %s221_s3, 128, %s357_s5, [#allocation3]  }
 0x1ba   :  { %287 = dma.done.wait [#allocation3], 128  }
 0x1bb   :  { %288 = vsyncadd [#allocation3], 4294967168 }
 0x1bc   :  { %227 = vsyncpa [#allocation3], 1 }

</bundles_post_ra>
